<compile_context>
chip_gen: v5e
topology: v5e:2x2
jax: 0.10.0
libtpu: 0.0.40
codegen_flags: <defaults>
</compile_context>

<pallas_src>
import functools

import jax
import jax.numpy as jnp
from jax.experimental import pallas as pl
from jax.experimental.pallas import tpu as pltpu

# ----------------------------- config ------------------------------------ #
D_IN = 3            # encoding.n_input_dims (xyz)
N_FREQS = 4         # frequency-encoding octaves
INCLUDE_XYZ = True
XYZ_SCALE = 2.0
XYZ_OFFSET = -1.0
RESEED_EVERY = 4    # re-seed the doubling recurrence with direct sincos

D_FREQ = 2 * D_IN * N_FREQS                      # encoding.n_output_dims
D_OUT = (D_IN if INCLUDE_XYZ else 0) + D_FREQ    # composite n_output_dims (27)

# VMEM accounting (channel-major blocks, f32, double-buffered):
#   input  (3->8 sublanes, tile lanes)  = 32 B/point
#   output (27->32 sublanes, tile lanes) = 128 B/point
_BYTES_PER_POINT_VMEM = 2 * (8 + 32) * 4          # 320 B/point
_VMEM_LIMIT_BYTES = 32 * 1024 * 1024              # safe scoped limit on v5e/v6e/v7x


def _round_up(x, m):
    return ((x + m - 1) // m) * m


def _choose_tile(n, tile_n):
    """Pick the point-tile: lane-aligned, VMEM-safe, >=2 blocks when possible."""
    lane_n = _round_up(n, 128)
    # Cap so double-buffered in+out blocks use at most ~3/4 of the scoped limit.
    max_tile = max(128, ((3 * _VMEM_LIMIT_BYTES // 4) // _BYTES_PER_POINT_VMEM) // 128 * 128)
    tile = min(_round_up(tile_n, 128), lane_n, max_tile)
    # v7x megacore: keep >= 2 roughly-even blocks when there is enough work.
    if lane_n >= 2 * 128 and pl.cdiv(lane_n, tile) < 2:
        tile = _round_up(pl.cdiv(lane_n, 2), 128)
    return tile


# ------------------------- cheap shared sincos ---------------------------- #
_TWO_OVER_PI = 0.6366197723675814
_PIO2_HI = 1.5703125                 # exact in float32
_PIO2_LO = 4.838267948966e-04        # pi/2 - _PIO2_HI


def _sincos(x):
    """sin(x), cos(x) from ONE shared range reduction (pure VPU ops).

    Accurate to a few f32 ulps for the bounded NeRF coordinate domain
    (|x| up to a few hundred is fine; the encoding feeds |x| <= ~1).
    """
    k = jnp.floor(x * _TWO_OVER_PI + 0.5)
    r = (x - k * _PIO2_HI) - k * _PIO2_LO          # r in [-pi/4, pi/4]
    r2 = r * r
    sin_r = r * (1.0 + r2 * (-1.0 / 6.0 + r2 * (1.0 / 120.0 - r2 * (1.0 / 5040.0))))
    cos_r = 1.0 + r2 * (-0.5 + r2 * (1.0 / 24.0
                                     + r2 * (-1.0 / 720.0 + r2 * (1.0 / 40320.0))))
    q = k - 4.0 * jnp.floor(k * 0.25)              # k mod 4, exact small ints
    sin_x = jnp.where(q == 0.0, sin_r,
            jnp.where(q == 1.0, cos_r,
            jnp.where(q == 2.0, -sin_r, -cos_r)))
    cos_x = jnp.where(q == 0.0, cos_r,
            jnp.where(q == 1.0, -sin_r,
            jnp.where(q == 2.0, -cos_r, sin_r)))
    return sin_x, cos_x


# ----------------------------- kernel ------------------------------------ #
def _composite_encoding_cm_kernel(x_ref, o_ref, *, include_xyz, xyz_scale,
                                  xyz_offset, n_freqs, reseed_every):
    # x_ref : (D_IN,  tile) VMEM block — lane-dense over points
    # o_ref : (D_OUT, tile) VMEM block
    x = x_ref[...].astype(jnp.float32)

    blocks = []
    if include_xyz:
        blocks.append(x * xyz_scale + xyz_offset)

    # Level 0 via the shared-reduction sincos; higher octaves via the
    # angle-doubling recurrence (VPU only), re-seeded every `reseed_every`
    # levels to bound error growth if N_FREQS is ever raised.
    s, c = _sincos(x)
    for level in range(n_freqs):
        blocks.append(s)
        blocks.append(c)
        nxt = level + 1
        if nxt < n_freqs:
            if nxt % reseed_every == 0:
                s, c = _sincos(x * (2.0 ** nxt))
            else:
                s, c = 2.0 * s * c, 2.0 * (c * c) - 1.0

    # Assemble the full feature block in registers (sublane concat -> XLU,
    # which is otherwise idle) and issue one (mostly unmasked) full-tile store.
    out = jnp.concatenate(blocks, axis=0)          # (D_OUT, tile) f32
    o_ref[...] = out.astype(o_ref.dtype)


# ----------------------------- wrappers ------------------------------------ #
def composite_encoding_cm(x_cm, *, tile_n=32768, out_dtype=None):
    """Channel-major CompositeEncoding: x_cm (D_IN, N) -> (D_OUT, N).

    Recommended entry point: no wrapper-side data movement — the pallas_call
    is the only HBM pass. A downstream MLP consumes the (D_OUT, N) result
    directly via dot_general dimension_numbers (no transpose needed).
    Pass out_dtype=jnp.bfloat16 to halve the HBM write stream.
    """
    d, n = x_cm.shape
    assert d == D_IN, f"expected leading dim {D_IN}, got {d}"
    out_dtype = x_cm.dtype if out_dtype is None else out_dtype

    tile = _choose_tile(n, tile_n)
    grid_n = pl.cdiv(n, tile)        # Pallas clips the ragged last block

    kernel = functools.partial(
        _composite_encoding_cm_kernel,
        include_xyz=INCLUDE_XYZ,
        xyz_scale=XYZ_SCALE,
        xyz_offset=XYZ_OFFSET,
        n_freqs=N_FREQS,
        reseed_every=RESEED_EVERY,
    )

    return pl.pallas_call(
        kernel,
        out_shape=jax.ShapeDtypeStruct((D_OUT, n), out_dtype),
        grid_spec=pltpu.PrefetchScalarGridSpec(
            num_scalar_prefetch=0,
            grid=(grid_n,),
            in_specs=[pl.BlockSpec((D_IN, tile), lambda i: (0, i))],
            out_specs=pl.BlockSpec((D_OUT, tile), lambda i: (0, i)),
        ),
        compiler_params=pltpu.CompilerParams(
            dimension_semantics=("parallel",),
            vmem_limit_bytes=_VMEM_LIMIT_BYTES,
        ),
    )(x_cm)


def composite_encoding(x, *, tile_n=32768, out_dtype=None):
    """Module-interface-compatible wrapper: x (N, D_IN) -> (N, D_OUT).

    NOTE: the two transposes here are full HBM passes that cost more than the
    kernel itself — production callers should use `composite_encoding_cm`
    (channel-major in/out) or fuse the encoding into the first MLP matmul.
    """
    n, d = x.shape
    assert d == D_IN, f"expected last dim {D_IN}, got {d}"
    out_cm = composite_encoding_cm(x.T, tile_n=tile_n, out_dtype=out_dtype)
    return out_cm.T


# --------------------------- pure-JAX reference ---------------------------- #
def composite_encoding_ref(x):
    feats = []
    if INCLUDE_XYZ:
        feats.append(x * XYZ_SCALE + XYZ_OFFSET)
    for level in range(N_FREQS):
        scaled = x * (2.0 ** level)
        feats.append(jnp.sin(scaled))
        feats.append(jnp.cos(scaled))
    return jnp.concatenate(feats, axis=-1)


# ------------------------------- main -------------------------------------- #
if __name__ == "__main__":
    key = jax.random.PRNGKey(0)

    # 1) Channel-major (recommended, zero-copy) path, small deterministic input.
    n_points = 16
    x = jax.random.uniform(key, (n_points, D_IN), dtype=jnp.float32)
    ref = composite_encoding_ref(x)                               # (N, 27)
    out_cm = jax.block_until_ready(composite_encoding_cm(x.T))    # (27, N)
    assert out_cm.shape == (D_OUT, n_points), out_cm.shape
    assert jnp.allclose(out_cm.T, ref, atol=3e-5, rtol=1e-5), "cm path mismatch"

    # 2) Module-interface path with a ragged N and a small tile: exercises
    #    grid clipping (no padding) and the >=2-block megacore split.
    n2 = 1000
    x2 = jax.random.uniform(jax.random.PRNGKey(1), (n2, D_IN), dtype=jnp.float32)
    out2 = jax.block_until_ready(composite_encoding(x2, tile_n=512))
    ref2 = composite_encoding_ref(x2)
    assert out2.shape == (n2, D_OUT), out2.shape
    assert jnp.allclose(out2, ref2, atol=3e-5, rtol=1e-5), "compat path mismatch"

    print("KERNEL_OK")
</pallas_src>

<mosaic_0001>
module attributes {stable_mosaic.version = 11 : i64} {
  func.func @_composite_encoding_cm_kernel(%arg0: i32, %arg1: memref<3x128xf32, #tpu.memory_space<vmem>>, %arg2: memref<27x128xf32, #tpu.memory_space<vmem>>) attributes {dimension_semantics = [#tpu.dimension_semantics<parallel>], iteration_bounds = array<i64: 1>, scalar_prefetch = 0 : i64, scratch_operands = 0 : i64, tpu.core_type = #tpu.core_type<tc>, window_params = [{transform_indices = @transform_0, window_bounds = array<i64: 3, 128>}, {transform_indices = @transform_1, window_bounds = array<i64: 27, 128>}]} {
    %c0 = arith.constant 0 : index
    %c0_0 = arith.constant 0 : index
    %0 = vector.load %arg1[%c0, %c0_0] : memref<3x128xf32, #tpu.memory_space<vmem>>, vector<3x128xf32>
    %cst = arith.constant 2.000000e+00 : f32
    %1 = vector.broadcast %cst : f32 to vector<3x128xf32>
    %2 = arith.mulf %0, %1 : vector<3x128xf32>
    %cst_1 = arith.constant -1.000000e+00 : f32
    %3 = vector.broadcast %cst_1 : f32 to vector<3x128xf32>
    %4 = arith.addf %2, %3 : vector<3x128xf32>
    %cst_2 = arith.constant 0.636619746 : f32
    %5 = vector.broadcast %cst_2 : f32 to vector<3x128xf32>
    %6 = arith.mulf %0, %5 : vector<3x128xf32>
    %cst_3 = arith.constant 5.000000e-01 : f32
    %7 = vector.broadcast %cst_3 : f32 to vector<3x128xf32>
    %8 = arith.addf %6, %7 : vector<3x128xf32>
    %9 = math.floor %8 : vector<3x128xf32>
    %cst_4 = arith.constant 1.5703125 : f32
    %10 = vector.broadcast %cst_4 : f32 to vector<3x128xf32>
    %11 = arith.mulf %9, %10 : vector<3x128xf32>
    %12 = arith.subf %0, %11 : vector<3x128xf32>
    %cst_5 = arith.constant 4.83826792E-4 : f32
    %13 = vector.broadcast %cst_5 : f32 to vector<3x128xf32>
    %14 = arith.mulf %9, %13 : vector<3x128xf32>
    %15 = arith.subf %12, %14 : vector<3x128xf32>
    %16 = arith.mulf %15, %15 : vector<3x128xf32>
    %cst_6 = arith.constant 1.98412701E-4 : f32
    %17 = vector.broadcast %cst_6 : f32 to vector<3x128xf32>
    %18 = arith.mulf %16, %17 : vector<3x128xf32>
    %cst_7 = arith.constant 0.00833333377 : f32
    %19 = vector.broadcast %cst_7 : f32 to vector<3x128xf32>
    %20 = arith.subf %19, %18 : vector<3x128xf32>
    %21 = arith.mulf %16, %20 : vector<3x128xf32>
    %cst_8 = arith.constant -0.166666672 : f32
    %22 = vector.broadcast %cst_8 : f32 to vector<3x128xf32>
    %23 = arith.addf %22, %21 : vector<3x128xf32>
    %24 = arith.mulf %16, %23 : vector<3x128xf32>
    %cst_9 = arith.constant 1.000000e+00 : f32
    %25 = vector.broadcast %cst_9 : f32 to vector<3x128xf32>
    %26 = arith.addf %25, %24 : vector<3x128xf32>
    %27 = arith.mulf %15, %26 : vector<3x128xf32>
    %cst_10 = arith.constant 2.48015876E-5 : f32
    %28 = vector.broadcast %cst_10 : f32 to vector<3x128xf32>
    %29 = arith.mulf %16, %28 : vector<3x128xf32>
    %cst_11 = arith.constant -0.00138888892 : f32
    %30 = vector.broadcast %cst_11 : f32 to vector<3x128xf32>
    %31 = arith.addf %30, %29 : vector<3x128xf32>
    %32 = arith.mulf %16, %31 : vector<3x128xf32>
    %cst_12 = arith.constant 0.0416666679 : f32
    %33 = vector.broadcast %cst_12 : f32 to vector<3x128xf32>
    %34 = arith.addf %33, %32 : vector<3x128xf32>
    %35 = arith.mulf %16, %34 : vector<3x128xf32>
    %cst_13 = arith.constant -5.000000e-01 : f32
    %36 = vector.broadcast %cst_13 : f32 to vector<3x128xf32>
    %37 = arith.addf %36, %35 : vector<3x128xf32>
    %38 = arith.mulf %16, %37 : vector<3x128xf32>
    %cst_14 = arith.constant 1.000000e+00 : f32
    %39 = vector.broadcast %cst_14 : f32 to vector<3x128xf32>
    %40 = arith.addf %39, %38 : vector<3x128xf32>
    %cst_15 = arith.constant 2.500000e-01 : f32
    %41 = vector.broadcast %cst_15 : f32 to vector<3x128xf32>
    %42 = arith.mulf %9, %41 : vector<3x128xf32>
    %43 = math.floor %42 : vector<3x128xf32>
    %cst_16 = arith.constant 4.000000e+00 : f32
    %44 = vector.broadcast %cst_16 : f32 to vector<3x128xf32>
    %45 = arith.mulf %44, %43 : vector<3x128xf32>
    %46 = arith.subf %9, %45 : vector<3x128xf32>
    %cst_17 = arith.constant 0.000000e+00 : f32
    %47 = vector.broadcast %cst_17 : f32 to vector<3x128xf32>
    %48 = arith.cmpf oeq, %46, %47 : vector<3x128xf32>
    %cst_18 = arith.constant 1.000000e+00 : f32
    %49 = vector.broadcast %cst_18 : f32 to vector<3x128xf32>
    %50 = arith.cmpf oeq, %46, %49 : vector<3x128xf32>
    %cst_19 = arith.constant 2.000000e+00 : f32
    %51 = vector.broadcast %cst_19 : f32 to vector<3x128xf32>
    %52 = arith.cmpf oeq, %46, %51 : vector<3x128xf32>
    %cst_20 = arith.constant 0.000000e+00 : f32
    %53 = vector.broadcast %cst_20 : f32 to vector<3x128xf32>
    %54 = arith.subf %53, %27 : vector<3x128xf32>
    %cst_21 = arith.constant 0.000000e+00 : f32
    %55 = vector.broadcast %cst_21 : f32 to vector<3x128xf32>
    %56 = arith.subf %55, %40 : vector<3x128xf32>
    %57 = arith.select %52, %54, %56 : vector<3x128xi1>, vector<3x128xf32>
    %58 = arith.select %50, %40, %57 : vector<3x128xi1>, vector<3x128xf32>
    %59 = arith.select %48, %27, %58 : vector<3x128xi1>, vector<3x128xf32>
    %cst_22 = arith.constant 0.000000e+00 : f32
    %60 = vector.broadcast %cst_22 : f32 to vector<3x128xf32>
    %61 = arith.cmpf oeq, %46, %60 : vector<3x128xf32>
    %cst_23 = arith.constant 1.000000e+00 : f32
    %62 = vector.broadcast %cst_23 : f32 to vector<3x128xf32>
    %63 = arith.cmpf oeq, %46, %62 : vector<3x128xf32>
    %cst_24 = arith.constant 0.000000e+00 : f32
    %64 = vector.broadcast %cst_24 : f32 to vector<3x128xf32>
    %65 = arith.subf %64, %27 : vector<3x128xf32>
    %cst_25 = arith.constant 2.000000e+00 : f32
    %66 = vector.broadcast %cst_25 : f32 to vector<3x128xf32>
    %67 = arith.cmpf oeq, %46, %66 : vector<3x128xf32>
    %cst_26 = arith.constant 0.000000e+00 : f32
    %68 = vector.broadcast %cst_26 : f32 to vector<3x128xf32>
    %69 = arith.subf %68, %40 : vector<3x128xf32>
    %70 = arith.select %67, %69, %27 : vector<3x128xi1>, vector<3x128xf32>
    %71 = arith.select %63, %65, %70 : vector<3x128xi1>, vector<3x128xf32>
    %72 = arith.select %61, %40, %71 : vector<3x128xi1>, vector<3x128xf32>
    %cst_27 = arith.constant 2.000000e+00 : f32
    %73 = vector.broadcast %cst_27 : f32 to vector<3x128xf32>
    %74 = arith.mulf %73, %59 : vector<3x128xf32>
    %75 = arith.mulf %74, %72 : vector<3x128xf32>
    %76 = arith.mulf %72, %72 : vector<3x128xf32>
    %cst_28 = arith.constant 2.000000e+00 : f32
    %77 = vector.broadcast %cst_28 : f32 to vector<3x128xf32>
    %78 = arith.mulf %77, %76 : vector<3x128xf32>
    %cst_29 = arith.constant 1.000000e+00 : f32
    %79 = vector.broadcast %cst_29 : f32 to vector<3x128xf32>
    %80 = arith.subf %78, %79 : vector<3x128xf32>
    %cst_30 = arith.constant 2.000000e+00 : f32
    %81 = vector.broadcast %cst_30 : f32 to vector<3x128xf32>
    %82 = arith.mulf %81, %75 : vector<3x128xf32>
    %83 = arith.mulf %82, %80 : vector<3x128xf32>
    %84 = arith.mulf %80, %80 : vector<3x128xf32>
    %cst_31 = arith.constant 2.000000e+00 : f32
    %85 = vector.broadcast %cst_31 : f32 to vector<3x128xf32>
    %86 = arith.mulf %85, %84 : vector<3x128xf32>
    %cst_32 = arith.constant 1.000000e+00 : f32
    %87 = vector.broadcast %cst_32 : f32 to vector<3x128xf32>
    %88 = arith.subf %86, %87 : vector<3x128xf32>
    %cst_33 = arith.constant 2.000000e+00 : f32
    %89 = vector.broadcast %cst_33 : f32 to vector<3x128xf32>
    %90 = arith.mulf %89, %83 : vector<3x128xf32>
    %91 = arith.mulf %90, %88 : vector<3x128xf32>
    %92 = arith.mulf %88, %88 : vector<3x128xf32>
    %cst_34 = arith.constant 2.000000e+00 : f32
    %93 = vector.broadcast %cst_34 : f32 to vector<3x128xf32>
    %94 = arith.mulf %93, %92 : vector<3x128xf32>
    %cst_35 = arith.constant 1.000000e+00 : f32
    %95 = vector.broadcast %cst_35 : f32 to vector<3x128xf32>
    %96 = arith.subf %94, %95 : vector<3x128xf32>
    %97 = tpu.concatenate %4, %59, %72, %75, %80, %83, %88, %91, %96 in 0 : vector<3x128xf32>, vector<3x128xf32>, vector<3x128xf32>, vector<3x128xf32>, vector<3x128xf32>, vector<3x128xf32>, vector<3x128xf32>, vector<3x128xf32>, vector<3x128xf32> -> vector<27x128xf32>
    %c0_36 = arith.constant 0 : index
    %c0_37 = arith.constant 0 : index
    %98 = vector.load %arg2[%c0_36, %c0_37] : memref<27x128xf32, #tpu.memory_space<vmem>>, vector<27x128xf32>
    tpu.vector_store %arg2[%c0_36, %c0_37], %97 {strides = array<i32>} : memref<27x128xf32, #tpu.memory_space<vmem>>, vector<27x128xf32>,
    return
  }
  func.func @transform_0(%arg0: i32) -> (i32, i32) {
    %c0_i32 = arith.constant 0 : i32
    %c0_i32_0 = arith.constant 0 : i32
    return %c0_i32, %arg0 : i32, i32
  }
  func.func @transform_1(%arg0: i32) -> (i32, i32) {
    %c0_i32 = arith.constant 0 : i32
    %c0_i32_0 = arith.constant 0 : i32
    return %c0_i32, %arg0 : i32, i32
  }
}

</mosaic_0001>

<bundles_post_ra>
// kernel: tpu_custom_call.1
= control target key start
LH: loop header
LB: loop body
LE: loop exit
PB: predicated region body
PF: predicated region fallthrough
CT: control target
= control target key end

     0   :  { %6 = vsyncpa [#allocation3], 0  ;;  %s152_s9 = smov [#allocation2]   ;;  %s178_s0 = inlined_call_operand.hbm [shape: f32[3,16], index: 0, kind: input, shape index: {}]   ;;  %s179_s1 = inlined_call_operand.vmem [shape: f32[27,16], index: 1, kind: output, shape index: {}]  }
   0x1   :  { %s12_s8 = sshll.u32 %s178_s0, 4  ;;  %s14_s10 = sshll.u32 %s152_s9, 4  ;;  %s13_s8 = int_to_ptr.hbm [resolvable:$true] %s12_s8  ;;  %s15_s10 = int_to_ptr.vmem [resolvable:$true] %s14_s10 }
   0x2   :  { %17 = dma.hbm_to_vmem [thread:$0]  %s13_s8, 64, %s15_s10, [#allocation3]  }
   0x3   :  { %150 = dma.done.wait [#allocation3], 64  }
   0x4   :  { %151 = vsyncadd [#allocation3], 4294967232  ;;  %v22_v0 = vld [vmem:[#allocation2] sm:$0x7]  ;;  %vm99_vm3 = vcmask 1042432   ;;  %vm101_vm4 = vcmask 1045504  }
   0x5   :  { %v25_v1 = vmul.f32 0.63661975, %v22_v0  ;;  %v23_v28 = vmul.f32 2.0, %v22_v0  ;;  %vm103_vm5 = vcmask 1040384   ;;  %vm105_vm6 = vcmask 1043456  }
   0x6   :  { %vm107_vm7 = vcmask 1046528   ;;  %vm109_vm8 = vcmask 1041408   ;;  %vm111_vm9 = vcmask 1044480  }
   0x7   :  { %v26_v2 = vadd.f32 0.5, %v25_v1  ;;  %v24_v33 = vadd.f32 -1.0, %v23_v28 }
   0x9   :  { %v27_v3 = vfloor.f32 %v26_v2 }
   0xb   :  { %v28_v4 = vmul.f32 1.5703125, %v27_v3  ;;  %v30_v5 = vmul.f32 0.0004838268, %v27_v3  ;;  %v48_v9 = vmul.f32 0.25, %v27_v3 }
   0xd   :  { %v29_v6 = vsub.f32 %v22_v0, %v28_v4  ;;  %v49_v14 = vfloor.f32 %v48_v9 }
   0xf   :  { %v31_v7 = vsub.f32 %v29_v6, %v30_v5  ;;  %v50_v19 = vmul.f32 4.0, %v49_v14 }
  0x11   :  { %v32_v8 = vmul.f32 %v31_v7, %v31_v7  ;;  %v51_v24 = vsub.f32 %v27_v3, %v50_v19 }
  0x13   :  { %v33_v10 = vmul.f32 0.0001984127, %v32_v8  ;;  %v40_v11 = vmul.f32 2.4801588e-05, %v32_v8  ;;  %vm54_vm0 = vcmp.eq.f32.partialorder %v51_v24, 2.0  ;;  %vm53_vm1 = vcmp.eq.f32.partialorder %v51_v24, 1.0 }
  0x14   :  { %vm52_vm2 = vcmp.eq.f32.partialorder %v51_v24, 0.0 }
  0x15   :  { %v34_v12 = vsub.f32 0.008333334, %v33_v10  ;;  %v41_v13 = vadd.f32 -0.0013888889, %v40_v11 }
  0x17   :  { %v35_v15 = vmul.f32 %v34_v12, %v32_v8  ;;  %v42_v16 = vmul.f32 %v41_v13, %v32_v8 }
  0x19   :  { %v36_v17 = vadd.f32 -0.16666667, %v35_v15  ;;  %v43_v18 = vadd.f32 0.041666668, %v42_v16 }
  0x1b   :  { %v37_v20 = vmul.f32 %v36_v17, %v32_v8  ;;  %v44_v21 = vmul.f32 %v43_v18, %v32_v8 }
  0x1d   :  { %v38_v22 = vadd.f32 1.0, %v37_v20  ;;  %v45_v23 = vadd.f32 -0.5, %v44_v21 }
  0x1f   :  { %v39_v25 = vmul.f32 %v38_v22, %v31_v7  ;;  %v46_v26 = vmul.f32 %v45_v23, %v32_v8 }
  0x21   :  { %v47_v27 = vadd.f32 1.0, %v46_v26  ;;  %v55_v29 = vsub.f32 0.0, %v39_v25 }
  0x23   :  { %v56_v30 = vsub.f32 0.0, %v47_v27 }
  0x25   :  { %v57_v31 = vsel %vm54_vm0, %v55_v29, %v56_v30  ;;  %v60_v32 = vsel %vm54_vm0, %v56_v30, %v39_v25 }
  0x26   :  { %v58_v34 = vsel %vm53_vm1, %v47_v27, %v57_v31  ;;  %v61_v35 = vsel %vm53_vm1, %v55_v29, %v60_v32 }
  0x27   :  { %v59_v36 = vsel %vm52_vm2, %v39_v25, %v58_v34  ;;  %v62_v37 = vsel %vm52_vm2, %v47_v27, %v61_v35 }
  0x28   :  { %v63_v38 = vmul.f32 2.0, %v59_v36  ;;  %v65_v39 = vmul.f32 %v62_v37, %v62_v37  ;;  %v79_v40 = vrot.slane %v59_v36, 5  ;;  %v82_v41 = vrot.slane %v62_v37, 2 }
  0x2a   :  { %v64_v42 = vmul.f32 %v63_v38, %v62_v37  ;;  %v66_v43 = vmul.f32 2.0, %v65_v39  ;;  %v100_v44 = vsel %vm99_vm3, %v24_v33, %v79_v40 }
  0x2b   :  { %v102_v45 = vsel %vm101_vm4, %v100_v44, %v82_v41 }
  0x2c   :  { %v122_v46 = vadd.f32 -1.0, %v66_v43  ;;  %113 = vst [vmem:[%s179_s1] sm:$0xff] %v102_v45  ;;  %v68_v47 = vmul.f32 2.0, %v64_v42  ;;  %v85_v48 = vrot.slane %v64_v42, 7 }
  0x2e   :  { %v69_v49 = vmul.f32 %v122_v46, %v68_v47  ;;  %v88_v50 = vrot.slane %v122_v46, 4  ;;  %v104_v51 = vsel %vm103_vm5, %v82_v41, %v85_v48  ;;  %v70_v52 = vmul.f32 %v122_v46, %v122_v46 }
  0x30   :  { %v91_v53 = vrot.slane %v69_v49, 1  ;;  %v106_v54 = vsel %vm105_vm6, %v104_v51, %v88_v50  ;;  %v71_v55 = vmul.f32 2.0, %v70_v52  ;;  %v73_v56 = vmul.f32 2.0, %v69_v49 }
  0x32   :  { %v108_v57 = vsel %vm107_vm7, %v106_v54, %v91_v53  ;;  %v123_v58 = vadd.f32 -1.0, %v71_v55 }
  0x33   :  { %114 = vst [vmem:[%s179_s1 + $0x8] sm:$0xff] %v108_v57 }
  0x34   :  { %v74_v59 = vmul.f32 %v123_v58, %v73_v56  ;;  %v94_v60 = vrot.slane %v123_v58, 6  ;;  %v75_v61 = vmul.f32 %v123_v58, %v123_v58 }
  0x36   :  { %v97_v62 = vrot.slane %v74_v59, 3  ;;  %v110_v63 = vsel %vm109_vm8, %v91_v53, %v94_v60  ;;  %v76_v0 = vmul.f32 2.0, %v75_v61 }
  0x38   :  { %v112_v1 = vsel %vm111_vm9, %v110_v63, %v97_v62  ;;  %v124_v2 = vadd.f32 -1.0, %v76_v0 }
  0x39   :  { %115 = vst [vmem:[%s179_s1 + $0x10] sm:$0xff] %v112_v1 }
  0x3a   :  { %116 = vst [vmem:[%s179_s1 + $0x18] sm:$0x7] %v124_v2 }
  0x3b   :  { %121 = vsyncpa [#allocation3], 1 }

</bundles_post_ra>
